<compile_context>
chip_gen: v7x
topology: tpu7x:2x2x1
jax: 0.10.0
libtpu: 0.0.40
codegen_flags: <defaults>
</compile_context>

<pallas_src>
import math
import functools

import jax
import jax.numpy as jnp
from jax import lax
from jax.experimental import pallas as pl
from jax.experimental.pallas import tpu as pltpu

# ----------------------------- configuration -----------------------------
B = 2            # batch
TS = (16, 16)    # scaleogram spatial size
KS = 3           # conv kernel size
DIL1 = 1         # dilation
S_CONV = 1       # stride (Conv2d default)
OC1 = 4          # conv output channels (small synthetic size)
I_DIM = 8        # LSTM input feature dim
SEQ = 8          # LSTM sequence length
H_DIM = 16       # LSTM hidden dim
L_DIM = 2        # LSTM layers (forward requires 2: cat(hn[0], hn[1]))
MLP_ODIM = 1     # output_len


def _conv_out(sz):
    return math.floor((sz - DIL1 * (KS - 1) - 1) / S_CONV) + 1


SIZE1_1 = _conv_out(_conv_out(_conv_out(TS[0])))
SIZE1_2 = _conv_out(_conv_out(_conv_out(TS[1])))
HW_FLAT = SIZE1_1 * SIZE1_2                       # 100 valid conv outputs
FUSION_IN = HW_FLAT + H_DIM * L_DIM               # 132
FUSION_HID = math.floor(FUSION_IN / 2)            # 66
HW_FRAME = TS[0] * TS[1]                          # 256-lane flat frame

# Containment invariant of the flat-frame conv trick: with stride 1 every valid
# output of every layer reads only valid (non-wrapped) input positions, and the
# flat offset p + kh*W + kw never carries across a row for valid columns.  The
# wrapped/garbage lanes are finite and get exactly-zero fc1 weight.
assert S_CONV == 1, "flat-frame conv trick requires stride 1"
assert SIZE1_1 > 0 and SIZE1_2 > 0, "conv stack must keep a positive valid region"


# ------------------ roll-convention probe (one tiny kernel) ------------------
@functools.lru_cache(maxsize=None)
def _roll_is_numpy_convention() -> bool:
    """True iff pltpu.roll(x, s, axis) matches jnp.roll (y[i] = x[i - s])."""
    def k(x_ref, o_ref):
        o_ref[...] = pltpu.roll(x_ref[...], shift=1, axis=1)

    vmem = pl.BlockSpec(memory_space=pltpu.MemorySpace.VMEM)
    x = jnp.tile(jnp.arange(128, dtype=jnp.float32)[None, :], (8, 1))
    y = pl.pallas_call(k, out_shape=jax.ShapeDtypeStruct((8, 128), jnp.float32),
                       in_specs=[vmem], out_specs=vmem)(x)
    return bool(y[0, 0] == 127.0)


# --------------------------- fully fused kernel ---------------------------
def _fused_kernel(x1_ref, x2_ref, c1w_ref, c1b_ref, c2w_ref, c2b_ref,
                  wih0_ref, whh0_ref, b0_ref, wih1_ref, whh1_ref, b1_ref,
                  w1a_ref, w1bc_ref, bfc1_ref, w2row_ref, bfc2_ref,
                  out_ref, hs0_ref, *, ks, dil, w0, roll_numpy):
    f32, bf16 = jnp.float32, jnp.bfloat16
    cin0 = x1_ref.shape[0]
    hw = x1_ref.shape[2]
    bsz = out_ref.shape[0]
    cout = c1b_ref.shape[0] // bsz
    hdim = whh0_ref.shape[0]
    seq = x2_ref.shape[0] // bsz

    # ------- conv stack: sublane-packed (cout*B, HW) accumulators, f32 VPU -------
    def conv_relu(x_rep, w_ref, b_ref, cin):
        # x_rep: list of cin arrays, each (cout*B, HW) = channel ci replicated
        # across output channels (sublanes). One roll + one FMA per tap.
        acc = jnp.zeros((cout * bsz, hw), f32)
        t = 0
        for ci in range(cin):
            for kh in range(ks):
                for kw in range(ks):
                    off = dil * (kh * w0 + kw)
                    tap = x_rep[ci]
                    if off:
                        shift = (hw - off) if roll_numpy else off
                        tap = pltpu.roll(tap, shift=shift, axis=1)   # XLU lane rotate
                    acc = acc + tap * w_ref[t]                       # (8,HW) * (8,1)
                    t += 1
        return jnp.maximum(acc + b_ref[...], 0.0)

    def replicate(act):
        # (cout*B, HW) packed activation -> per-input-channel replicas (cout*B, HW)
        cin = act.shape[0] // bsz
        return [jnp.concatenate([act[c * bsz:(c + 1) * bsz]] * cout, axis=0)
                for c in range(cin)]

    x1 = x1_ref[...]                                    # (cin0, cout*B, HW), host-replicated
    act = conv_relu([x1[c] for c in range(cin0)], c1w_ref, c1b_ref, cin0)   # conv1 + ReLU
    act = conv_relu(replicate(act), c2w_ref, c2b_ref, cout)                 # conv2 + ReLU
    act = conv_relu(replicate(act), c2w_ref, c2b_ref, cout)                 # conv2 (reused) + ReLU

    # torch.amax over channels, still in the flat frame (garbage lanes get zero
    # fc1 weight, so no compaction / gather is ever needed).
    x_cmax = act[0:bsz]
    for c in range(1, cout):
        x_cmax = jnp.maximum(x_cmax, act[c * bsz:(c + 1) * bsz])            # (B, HW)

    # ---------------- 2-layer LSTM: layer-sequential, gates (i, f, o, g) ----------------
    def gates(g):
        s = jax.nn.sigmoid(g[:, :3 * hdim])             # one EUP launch for i,f,o
        gg = jnp.tanh(g[:, 3 * hdim:])                  # one for g
        return s[:, :hdim], s[:, hdim:2 * hdim], s[:, 2 * hdim:3 * hdim], gg

    def run_layer(xp, whh_bf, store):
        h = jnp.zeros((bsz, hdim), f32)
        c = jnp.zeros((bsz, hdim), f32)
        for t in range(seq):                            # static unroll (seq = 8)
            g = xp[t * bsz:(t + 1) * bsz, :] + jnp.dot(
                h.astype(bf16), whh_bf, preferred_element_type=f32)
            i, f, o, gg = gates(g)
            c = f * c + i * gg
            h = o * jnp.tanh(c)
            if store:
                hs0_ref[t * bsz:(t + 1) * bsz, :] = h
        return h

    # layer 0: hoisted input projection = one (seq*B, I) @ (I, 4H) bf16 matmul
    xp0 = jnp.dot(x2_ref[...].astype(bf16), wih0_ref[...],
                  preferred_element_type=f32) + b0_ref[...]
    h0 = run_layer(xp0, whh0_ref[...], store=True)
    # TODO(synk): nn.LSTM inter-layer dropout (p=0.4) is identity in eval mode.
    # layer 1: its input projection is hoisted over the stored layer-0 outputs
    xp1 = jnp.dot(hs0_ref[...].astype(bf16), wih1_ref[...],
                  preferred_element_type=f32) + b1_ref[...]
    h1 = run_layer(xp1, whh1_ref[...], store=False)

    # -------------------- amax / concat / MLP head --------------------
    hn = jnp.concatenate([h0, h1], axis=1)              # single (B, 2H) concat (not per step)
    h = (jnp.dot(x_cmax.astype(bf16), w1a_ref[...], preferred_element_type=f32)
         + jnp.dot(hn.astype(bf16), w1bc_ref[...], preferred_element_type=f32)
         + bfc1_ref[...])
    h = jnp.maximum(h, 0.0)
    # TODO(synk): nn.Dropout(d_prob) between fc1 and fc2 is identity in eval mode.
    # fc2 has a single output column -> VPU multiply + lane reduction (no MXU push).
    out_ref[...] = jnp.sum(h * w2row_ref[...], axis=1, keepdims=True) + bfc2_ref[...]


# --------------------------- parameter packing ---------------------------
def pack_params(p):
    """One-time host-side re-layout of the PyTorch-style params for the kernel."""

    def conv_cols(w):  # (cout, cin, ks, ks) -> (cin*ks*ks, cout*B, 1) per-tap columns
        cout, cin = w.shape[0], w.shape[1]
        wt = jnp.transpose(w, (1, 2, 3, 0)).reshape(cin * KS * KS, cout)   # [tap, co]
        return jnp.repeat(wt, B, axis=1).reshape(cin * KS * KS, cout * B, 1)

    def bias_col(b):   # (cout,) -> (cout*B, 1)
        return jnp.repeat(b, B).reshape(-1, 1)

    def reorder_gates(w):  # 4H columns (i,f,g,o) -> (i,f,o,g)
        h = H_DIM
        return jnp.concatenate([w[..., :2 * h], w[..., 3 * h:], w[..., 2 * h:3 * h]],
                               axis=-1)

    # fc1 rows for the conv part, scattered into the 256-lane flat frame
    # (row r*16+c <- fc1 row r*10+c; all other rows are zero so garbage lanes
    #  in the conv frame contribute nothing).
    w1a = p["fc1_w_t"][:HW_FLAT]                                           # (100, 66)
    rows = (jnp.arange(SIZE1_1)[:, None] * TS[1]
            + jnp.arange(SIZE1_2)[None, :]).reshape(-1)                    # (100,)
    w1a_pad = jnp.zeros((HW_FRAME, FUSION_HID), jnp.float32).at[rows].set(w1a)

    bf16 = jnp.bfloat16
    return {
        # conv (VPU, f32): per-tap (cout*B, 1) weight columns + bias columns
        "c1w_col": conv_cols(p["conv1_w"]),
        "c1b_col": bias_col(p["conv1_b"]),
        "c2w_col": conv_cols(p["conv2_w"]),
        "c2b_col": bias_col(p["conv2_b"]),
        # LSTM (MXU operands bf16, gate order i,f,o,g; biases stay f32)
        "wih0_bf": reorder_gates(p["wih0_t"]).astype(bf16),
        "whh0_bf": reorder_gates(p["whh0_t"]).astype(bf16),
        "b0": reorder_gates(p["b0"]),
        "wih1_bf": reorder_gates(p["wih1_t"]).astype(bf16),
        "whh1_bf": reorder_gates(p["whh1_t"]).astype(bf16),
        "b1": reorder_gates(p["b1"]),
        # MLP head
        "fc1_wa_pad_bf": w1a_pad.astype(bf16),                             # (256, 66)
        "fc1_wbc_bf": p["fc1_w_t"][HW_FLAT:].astype(bf16),                 # (2H, 66)
        "fc1_b": p["fc1_b"],
        "fc2_w_row": p["fc2_w_t"].T,                                       # (1, 66) f32
        "fc2_b": p["fc2_b"],
    }


# ------------------------------- full forward -------------------------------
def cnn_lstm_forward(x1, x2, kp, *, roll_numpy):
    bsz, cin, hh, ww = x1.shape
    seq, idim = x2.shape[1], x2.shape[2]

    # layout plumbing (wrapper side, one-time relayouts): channel-major,
    # sublane-replicated scaleograms and a time-major flattened LSTM input so
    # the kernel only does leading-dim / contiguous sublane indexing.
    x1f = jnp.transpose(x1, (1, 0, 2, 3)).reshape(cin, bsz, hh * ww)        # (3, B, 256)
    x1_rep = jnp.tile(x1f, (1, OC1, 1))                                     # (3, OC1*B, 256)
    x2f = jnp.transpose(x2, (1, 0, 2)).reshape(seq * bsz, idim)             # (T*B, I)

    kern = functools.partial(_fused_kernel, ks=KS, dil=DIL1, w0=ww,
                             roll_numpy=roll_numpy)
    vmem = pl.BlockSpec(memory_space=pltpu.MemorySpace.VMEM)
    return pl.pallas_call(
        kern,
        out_shape=jax.ShapeDtypeStruct((bsz, MLP_ODIM), jnp.float32),
        in_specs=[vmem] * 17,
        out_specs=vmem,
        scratch_shapes=[pltpu.VMEM((seq * bsz, H_DIM), jnp.float32)],       # layer-0 h outputs
        compiler_params=pltpu.CompilerParams(vmem_limit_bytes=16 * 1024 * 1024),
    )(x1_rep, x2f,
      kp["c1w_col"], kp["c1b_col"], kp["c2w_col"], kp["c2b_col"],
      kp["wih0_bf"], kp["whh0_bf"], kp["b0"], kp["wih1_bf"], kp["whh1_bf"], kp["b1"],
      kp["fc1_wa_pad_bf"], kp["fc1_wbc_bf"], kp["fc1_b"],
      kp["fc2_w_row"], kp["fc2_b"])


# ------------------------------ pure-JAX reference ------------------------------
def reference_forward(x1, x2, p):
    def conv_relu_ref(x, w, b):
        y = lax.conv_general_dilated(x, w, window_strides=(1, 1), padding="VALID",
                                     rhs_dilation=(DIL1, DIL1),
                                     dimension_numbers=("NCHW", "OIHW", "NCHW"))
        return jax.nn.relu(y + b[None, :, None, None])

    a = conv_relu_ref(x1, p["conv1_w"], p["conv1_b"])
    a = conv_relu_ref(a, p["conv2_w"], p["conv2_b"])
    a = conv_relu_ref(a, p["conv2_w"], p["conv2_b"])
    Bsz, C, Hc, Wc = a.shape
    xD1_inter = a.reshape(Bsz, C, Hc * Wc)

    def cell(xt, h, c, wih_t, whh_t, b):
        g = xt @ wih_t + h @ whh_t + b
        i = jax.nn.sigmoid(g[:, :H_DIM])
        f = jax.nn.sigmoid(g[:, H_DIM:2 * H_DIM])
        gg = jnp.tanh(g[:, 2 * H_DIM:3 * H_DIM])
        o = jax.nn.sigmoid(g[:, 3 * H_DIM:])
        c = f * c + i * gg
        return o * jnp.tanh(c), c

    h0 = c0 = h1 = c1 = jnp.zeros((x2.shape[0], H_DIM), jnp.float32)
    for t in range(x2.shape[1]):
        xt = x2[:, t, :]
        h0, c0 = cell(xt, h0, c0, p["wih0_t"], p["whh0_t"], p["b0"])
        h1, c1 = cell(h0, h1, c1, p["wih1_t"], p["whh1_t"], p["b1"])
    hn = jnp.concatenate([h0, h1], axis=1)

    x_d1 = jnp.max(xD1_inter, axis=1)
    x = jnp.concatenate([x_d1, hn], axis=1)
    h = jax.nn.relu(x @ p["fc1_w_t"] + p["fc1_b"])
    return h @ p["fc2_w_t"] + p["fc2_b"]


# ------------------------------- parameters -------------------------------
def init_params(key):
    ks = jax.random.split(key, 14)

    def rnd(k, shape, fan_in):
        return (jax.random.normal(k, shape, dtype=jnp.float32) / jnp.sqrt(float(fan_in)))

    p = {}
    p["conv1_w"] = rnd(ks[0], (OC1, 3, KS, KS), 3 * KS * KS)
    p["conv1_b"] = rnd(ks[1], (OC1,), 3 * KS * KS)
    p["conv2_w"] = rnd(ks[2], (OC1, OC1, KS, KS), OC1 * KS * KS)
    p["conv2_b"] = rnd(ks[3], (OC1,), OC1 * KS * KS)
    # LSTM layer 0 (input I_DIM) and layer 1 (input H_DIM); gate order i,f,g,o.
    p["wih0_t"] = rnd(ks[4], (I_DIM, 4 * H_DIM), I_DIM)
    p["whh0_t"] = rnd(ks[5], (H_DIM, 4 * H_DIM), H_DIM)
    p["b0"] = rnd(ks[6], (1, 4 * H_DIM), H_DIM)           # b_ih + b_hh folded
    p["wih1_t"] = rnd(ks[7], (H_DIM, 4 * H_DIM), H_DIM)
    p["whh1_t"] = rnd(ks[8], (H_DIM, 4 * H_DIM), H_DIM)
    p["b1"] = rnd(ks[9], (1, 4 * H_DIM), H_DIM)
    # MLP head
    p["fc1_w_t"] = rnd(ks[10], (FUSION_IN, FUSION_HID), FUSION_IN)
    p["fc1_b"] = rnd(ks[11], (1, FUSION_HID), FUSION_IN)
    p["fc2_w_t"] = rnd(ks[12], (FUSION_HID, MLP_ODIM), FUSION_HID)
    p["fc2_b"] = rnd(ks[13], (1, MLP_ODIM), FUSION_HID)
    return p


if __name__ == "__main__":
    key = jax.random.PRNGKey(0)
    k1, k2, kparam = jax.random.split(key, 3)
    x1 = jax.random.normal(k1, (B, 3, TS[0], TS[1]), dtype=jnp.float32)   # scaleograms (NCHW)
    x2 = jax.random.normal(k2, (B, SEQ, I_DIM), dtype=jnp.float32)        # LSTM sequence
    params = init_params(kparam)
    kparams = pack_params(params)                                         # one-time re-layout

    roll_numpy = _roll_is_numpy_convention()                              # probe roll direction
    forward = jax.jit(functools.partial(cnn_lstm_forward, roll_numpy=roll_numpy))
    out = forward(x1, x2, kparams)
    out = jax.block_until_ready(out)

    ref = reference_forward(x1, x2, params)
    assert out.shape == (B, MLP_ODIM), out.shape
    # bf16 MXU operands (f32 accumulate) -> slightly looser tolerance than pure f32.
    assert jnp.allclose(out, ref, atol=2.5e-2, rtol=2.5e-2), (out, ref)

    print("KERNEL_OK")
</pallas_src>

<mosaic_0001>
module attributes {stable_mosaic.version = 11 : i64} {
  func.func @k(%arg0: memref<8x128xf32, #tpu.memory_space<vmem>>, %arg1: memref<8x128xf32, #tpu.memory_space<vmem>>) attributes {dimension_semantics = [], scalar_prefetch = 0 : i64, scratch_operands = 0 : i64, tpu.core_type = #tpu.core_type<tc>} {
    %c0 = arith.constant 0 : index
    %c0_0 = arith.constant 0 : index
    %0 = vector.load %arg0[%c0, %c0_0] : memref<8x128xf32, #tpu.memory_space<vmem>>, vector<8x128xf32>
    %c1_i32 = arith.constant 1 : i32
    %1 = tpu.dynamic_rotate %0 by %c1_i32 dim 1 : vector<8x128xf32>, i32 -> vector<8x128xf32>
    %c0_1 = arith.constant 0 : index
    %c0_2 = arith.constant 0 : index
    %2 = vector.load %arg1[%c0_1, %c0_2] : memref<8x128xf32, #tpu.memory_space<vmem>>, vector<8x128xf32>
    tpu.vector_store %arg1[%c0_1, %c0_2], %1 {strides = array<i32>} : memref<8x128xf32, #tpu.memory_space<vmem>>, vector<8x128xf32>,
    return
  }
}

</mosaic_0001>

<bundles_post_ra>
// kernel: tpu_custom_call.1
= control target key start
LH: loop header
LB: loop body
LE: loop exit
PB: predicated region body
PF: predicated region fallthrough
CT: control target
= control target key end

     0   :  { %6 = vsyncpa [#allocation3], 0  ;;  %s128_s0 = inlined_call_operand.hbm [shape: f32[8,128], index: 0, kind: input, shape index: {}]   ;;  %s129_s1 = inlined_call_operand.hbm [shape: f32[8,128], index: 1, kind: output, shape index: {}]  }
   0x1   :  { %7 = vsyncpa [#allocation4], 0  ;;  %s91_s6 = smov [#allocation2]   ;;  %s43_s10 = scalar_lea.hbm %s128_s0, 128 }
   0x2   :  { %s14_s7 = sshll.u32 %s91_s6, 4  ;;  %p44_p0 = scmp.ne.s32.totalorder %s128_s0, %s43_s10  ;;  %s15_s7 = int_to_ptr.vmem [resolvable:$true] %s14_s7 }
   0x3   :  { %p47_p1 = scmp.lt.u32.totalorder %s43_s10, %s128_s0 }
   0x5   :  { %p49_p2 = pnand %p47_p1, %p44_p0 }
   0x7   :  { %52 = shalt.err (!%p49_p2)
}
   0x8   :  { %s53_s15 = scalar_lea.vmem %s15_s7, 128  ;;  %p58_p4 = scmp.lt.s32.totalorder %s15_s7, %s15_s7 }
   0x9   :  { %p54_p3 = scmp.ne.s32.totalorder %s15_s7, %s53_s15  ;;  %p59_p5 = scmp.lt.s32.totalorder %s53_s15, %s53_s15 }
   0xb   :  { %p60_p6 = por %p59_p5, %p58_p4 }
   0xd   :  { %p61_p7 = pnand %p60_p6, %p54_p3 }
   0xf   :  { %64 = shalt.err (!%p61_p7)
}
  0x10   :  { %17 = dma.hbm_to_vmem [thread:$0]  %s128_s0, 128, %s15_s7, [#allocation3]  }
  0x11   :  { %87 = dma.done.wait [#allocation3], 128  }
  0x12   :  { %88 = vsyncadd [#allocation3], 4294967168  ;;  %v21_v0 = vld [vmem:[#allocation2] sm:$0xff]  ;;  %s92_s18 = smov 1   ;;  %s93_s19 = smov [#allocation5]  }
  0x13   :  { %22 = vrot.lane.b32.xlu0 %v21_v0, %s92_s18  ;;  %s31_s20 = sshll.u32 %s93_s19, 4  ;;  %s32_s20 = int_to_ptr.vmem [resolvable:$true] %s31_s20 }
  0x14   :  { %s65_s21 = scalar_lea.vmem %s32_s20, 128  ;;  %p70_p9 = scmp.lt.s32.totalorder %s32_s20, %s32_s20 }
  0x15   :  { %p66_p8 = scmp.ne.s32.totalorder %s32_s20, %s65_s21  ;;  %p71_p10 = scmp.lt.s32.totalorder %s65_s21, %s65_s21 }
  0x17   :  { %p72_p11 = por %p71_p10, %p70_p9 }
  0x19   :  { %p73_p12 = pnand %p72_p11, %p66_p8 }
  0x85   :  { %v23_v1 = vpop.permute.xlu0 %22 }
  0x86   :  { %24 = vst [vmem:[#allocation5] sm:$0xff] %v23_v1 }
  0x87   :  { %76 = shalt.err (!%p73_p12)
}
  0x88   :  { %s77_s0 = scalar_lea.hbm %s129_s1, 128 }
  0x89   :  { %p78_p13 = scmp.ne.s32.totalorder %s129_s1, %s77_s0  ;;  %p81_p0 = scmp.lt.u32.totalorder %s77_s0, %s129_s1 }
  0x8b   :  { %p83_p1 = pnand %p81_p0, %p78_p13 }
  0x8d   :  { %86 = shalt.err (!%p83_p1)
}
  0x8e   :  { %34 = dma.vmem_to_hbm [thread:$0]  %s32_s20, 128, %s129_s1, [#allocation4]  }
  0x8f   :  { %89 = dma.done.wait [#allocation4], 128  }
  0x90   :  { %90 = vsyncadd [#allocation4], 4294967168 }
  0x91   :  { %38 = vsyncpa [#allocation3], 1 }
  0x92   :  { %39 = vsyncpa [#allocation4], 1 }

</bundles_post_ra>
